<compile_context>
chip_gen: v6e
topology: v6e:2x2x1
jax: 0.10.0
libtpu: 0.0.40
codegen_flags: <defaults>
</compile_context>

<pallas_src>
from functools import partial

import jax
import jax.numpy as jnp
from jax.experimental import pallas as pl
from jax.experimental.pallas import tpu as pltpu


def _ggca_kernel(x_ref, a_ref, sel_ref, e_ref, w1_ref, b1_ref, w2_ref, b2_ref,
                 out_ref, *, H, W):
    # x_ref / out_ref: (R, H*W) with R = K*gc      (lane-dense slab of K groups)
    # a_ref:   (HW, H+W)  avg-pool matrix  [over-W | over-H]
    # sel_ref: (HW, H)    picks lane h*W (start of each W-window) -> column h
    # e_ref:   (H+W, 2HW) expands [att_h | att_w] to two lane-dense (HW) maps
    # w1_ref:  (K*hid, R) block-diagonal   b1_ref: (K*hid, 1)
    # w2_ref:  (R, K*hid) block-diagonal   b2_ref: (R, 1)
    HW = H * W
    xf = x_ref[...].astype(jnp.float32)                                     # (R, HW)

    # ---- average pooling on the MXU: [p_h_avg | p_w_avg] --------------------
    pool_avg = jnp.dot(xf, a_ref[...], preferred_element_type=jnp.float32)  # (R, H+W)

    # ---- p_w_max: fold the H row-groups in half (big contiguous slices) -----
    t = xf
    g = H
    while g > 1:
        half = g // 2
        folded = jnp.maximum(t[:, :half * W], t[:, (g - half) * W:g * W])
        if g % 2 == 1:  # keep the untouched middle group
            t = jnp.concatenate([folded, t[:, half * W:(half + 1) * W]], axis=1)
            g = half + 1
        else:
            t = folded
            g = half
    p_w_max = t                                                             # (R, W)

    # ---- p_h_max: sliding-window max of width W via shift-doubling, then ----
    # ---- compact the window starts (lanes h*W) with a 0/1 matmul on the MXU -
    t = xf
    win = 1
    while win < W:
        step = min(win, W - win)
        t = jnp.maximum(t, jnp.concatenate([t[:, step:], t[:, :step]], axis=1))
        win += step
    p_h_max = jnp.dot(t, sel_ref[...], preferred_element_type=jnp.float32)  # (R, H)

    # ---- shared MLP applied once: [avg | max] branches of all K slabs -------
    p_all = jnp.concatenate([pool_avg, p_h_max, p_w_max], axis=1)           # (R, 2H+2W)
    h1 = jnp.dot(w1_ref[...], p_all, preferred_element_type=jnp.float32) + b1_ref[...]
    h1 = jnp.maximum(h1, 0.0)
    y = jnp.dot(w2_ref[...], h1, preferred_element_type=jnp.float32) + b2_ref[...]

    lhw = H + W
    att = jax.nn.sigmoid(y[:, :lhw] + y[:, lhw:])                           # [att_h | att_w]

    # ---- expand attention back to the lane-dense (R, HW) layout on the MXU --
    att_e = jnp.dot(att, e_ref[...], preferred_element_type=jnp.float32)    # (R, 2*HW)
    att_full = att_e[:, :HW] * att_e[:, HW:]                                # (R, HW)
    out_ref[...] = (xf * att_full).astype(out_ref.dtype)


def _pick_k(bg, gc, hw, itemsize, block_budget_bytes=4 << 20):
    """Largest K (slabs per step) with K | BG, sublane-aligned block rows and a
    per-block VMEM footprint under budget; prefer an even number of grid steps
    (2 TensorCores on v7x)."""
    feasible = []
    for k in range(1, bg + 1):
        if bg % k:
            continue
        if (k * gc) % 8 and k != bg:     # (8, 128) alignment rule for blocks
            continue
        if k * gc * hw * itemsize > block_budget_bytes:
            continue
        feasible.append(k)
    if not feasible:
        return bg                         # fall back to one full-array block
    even = [k for k in feasible if (bg // k) % 2 == 0]
    return max(even) if even else max(feasible)


def ggca_forward(x, params, *, num_groups, reduction):
    """x: (B, C, H, W) float32, NCHW. Returns (B, C, H, W)."""
    B, C, H, W = x.shape
    assert C % num_groups == 0
    gc = C // num_groups
    hid = gc // reduction
    assert hid >= 1
    BG = B * num_groups
    HW = H * W
    f32 = jnp.float32

    (w1, b1, bn_gamma, bn_beta, bn_mean, bn_var, w2, b2) = params
    eps = 1e-5
    # Fold eval-mode BatchNorm into the first 1x1 conv.
    s = bn_gamma / jnp.sqrt(bn_var + eps)              # (hid,)
    w1f = w1 * s[:, None]                              # (hid, gc)
    b1f = s * (b1 - bn_mean) + bn_beta                 # (hid,)

    K = _pick_k(BG, gc, HW, jnp.dtype(x.dtype).itemsize)
    R = K * gc                                          # rows per block

    # Block-diagonal weights so a single 2-D matmul serves all K slabs.
    eye_k = jnp.eye(K, dtype=f32)
    w1_bd = jnp.kron(eye_k, w1f)                        # (K*hid, K*gc)
    b1_bd = jnp.tile(b1f, K)[:, None]                   # (K*hid, 1)
    w2_bd = jnp.kron(eye_k, w2)                         # (K*gc, K*hid)
    b2_bd = jnp.tile(b2, K)[:, None]                    # (K*gc, 1)

    # Constant average-pooling matrix [over-W | over-H].
    a_h = jnp.repeat(jnp.eye(H, dtype=f32), W, axis=0) / W           # (HW, H)
    a_w = jnp.tile(jnp.eye(W, dtype=f32), (H, 1)) / H                # (HW, W)
    a_mat = jnp.concatenate([a_h, a_w], axis=1)                      # (HW, H+W)
    # Selection matrix: lane h*W -> column h (compacts the window maxes).
    sel = jnp.zeros((HW, H), f32).at[jnp.arange(H) * W, jnp.arange(H)].set(1.0)
    # Expansion matrix: att_h fills first HW lanes, att_w fills last HW lanes.
    e_h = jnp.repeat(jnp.eye(H, dtype=f32), W, axis=1)               # (H, HW)
    e_w = jnp.tile(jnp.eye(W, dtype=f32), (1, H))                    # (W, HW)
    e_mat = jnp.concatenate(
        [jnp.concatenate([e_h, jnp.zeros((H, HW), f32)], axis=1),
         jnp.concatenate([jnp.zeros((W, HW), f32), e_w], axis=1)], axis=0)  # (H+W, 2HW)

    xf = x.reshape(BG * gc, HW)                         # lane-dense view (free)

    out = pl.pallas_call(
        partial(_ggca_kernel, H=H, W=W),
        out_shape=jax.ShapeDtypeStruct(xf.shape, x.dtype),
        grid_spec=pltpu.PrefetchScalarGridSpec(
            num_scalar_prefetch=0,
            grid=(BG // K,),
            in_specs=[
                pl.BlockSpec((R, HW), lambda i: (i, 0)),
                pl.BlockSpec((HW, H + W), lambda i: (0, 0)),
                pl.BlockSpec((HW, H), lambda i: (0, 0)),
                pl.BlockSpec((H + W, 2 * HW), lambda i: (0, 0)),
                pl.BlockSpec((K * hid, R), lambda i: (0, 0)),
                pl.BlockSpec((K * hid, 1), lambda i: (0, 0)),
                pl.BlockSpec((R, K * hid), lambda i: (0, 0)),
                pl.BlockSpec((R, 1), lambda i: (0, 0)),
            ],
            out_specs=pl.BlockSpec((R, HW), lambda i: (i, 0)),
        ),
        compiler_params=pltpu.CompilerParams(
            dimension_semantics=("parallel",),
            vmem_limit_bytes=32 * 1024 * 1024),
    )(xf, a_mat, sel, e_mat, w1_bd, b1_bd, w2_bd, b2_bd)

    return out.reshape(B, C, H, W)


def ggca_reference(x, params, *, num_groups, reduction):
    """Pure-JAX reference (same eval-mode BN fold) for verification."""
    B, C, H, W = x.shape
    gc = C // num_groups
    (w1, b1, bn_gamma, bn_beta, bn_mean, bn_var, w2, b2) = params
    eps = 1e-5
    s = bn_gamma / jnp.sqrt(bn_var + eps)
    w1f = w1 * s[:, None]
    b1f = s * (b1 - bn_mean) + bn_beta

    xg = x.reshape(B * num_groups, gc, H, W)
    p_h_avg = jnp.mean(xg, axis=3)  # (BG, gc, H)
    p_h_max = jnp.max(xg, axis=3)
    p_w_avg = jnp.mean(xg, axis=2)  # (BG, gc, W)
    p_w_max = jnp.max(xg, axis=2)

    def mlp(p):  # (BG, gc, L)
        h = jnp.einsum('oc,bcl->bol', w1f, p) + b1f[None, :, None]
        h = jnp.maximum(h, 0.0)
        return jnp.einsum('co,bol->bcl', w2, h) + b2[None, :, None]

    att_h = jax.nn.sigmoid(mlp(p_h_avg) + mlp(p_h_max))  # (BG, gc, H)
    att_w = jax.nn.sigmoid(mlp(p_w_avg) + mlp(p_w_max))  # (BG, gc, W)
    out = xg * att_h[:, :, :, None] * att_w[:, :, None, :]
    return out.reshape(B, C, H, W)


def init_params(key, gc, hid):
    ks = jax.random.split(key, 4)
    w1 = jax.random.normal(ks[0], (hid, gc), jnp.float32) * 0.1
    b1 = jax.random.normal(ks[1], (hid,), jnp.float32) * 0.1
    bn_gamma = jnp.ones((hid,), jnp.float32)
    bn_beta = jnp.zeros((hid,), jnp.float32)
    bn_mean = jnp.zeros((hid,), jnp.float32)
    bn_var = jnp.ones((hid,), jnp.float32)
    w2 = jax.random.normal(ks[2], (gc, hid), jnp.float32) * 0.1
    b2 = jax.random.normal(ks[3], (gc,), jnp.float32) * 0.1
    return (w1, b1, bn_gamma, bn_beta, bn_mean, bn_var, w2, b2)


if __name__ == "__main__":
    # Small shapes consistent with the module: C divisible by num_groups,
    # group_channels divisible by reduction; H*W = 256 (lane-dense).
    B, C, H, W = 2, 40, 16, 16
    num_groups, reduction = 5, 4           # gc = 8, hidden = 2
    gc = C // num_groups
    hid = gc // reduction

    key = jax.random.PRNGKey(0)
    kx, kp = jax.random.split(key)
    x = jax.random.normal(kx, (B, C, H, W), jnp.float32)
    params = init_params(kp, gc, hid)

    out = ggca_forward(x, params, num_groups=num_groups, reduction=reduction)
    out = jax.block_until_ready(out)

    ref = ggca_reference(x, params, num_groups=num_groups, reduction=reduction)
    assert out.shape == (B, C, H, W)
    # Tolerance leaves margin for reduced-precision f32 MXU passes in the
    # pooling / MLP / expansion matmuls; real indexing/attention bugs produce
    # O(0.1+) errors and would still trip this check.
    assert jnp.allclose(out, ref, atol=5e-3, rtol=5e-3), "mismatch vs reference"

    print("KERNEL_OK")
</pallas_src>

<mosaic_0001>
module attributes {stable_mosaic.version = 11 : i64} {
  func.func @_ggca_kernel(%arg0: i32, %arg1: memref<40x256xf32, #tpu.memory_space<vmem>>, %arg2: memref<256x32xf32, #tpu.memory_space<vmem>>, %arg3: memref<256x16xf32, #tpu.memory_space<vmem>>, %arg4: memref<32x512xf32, #tpu.memory_space<vmem>>, %arg5: memref<10x40xf32, #tpu.memory_space<vmem>>, %arg6: memref<10x1xf32, #tpu.memory_space<vmem>>, %arg7: memref<40x10xf32, #tpu.memory_space<vmem>>, %arg8: memref<40x1xf32, #tpu.memory_space<vmem>>, %arg9: memref<40x256xf32, #tpu.memory_space<vmem>>) attributes {dimension_semantics = [#tpu.dimension_semantics<parallel>], iteration_bounds = array<i64: 2>, scalar_prefetch = 0 : i64, scratch_operands = 0 : i64, tpu.core_type = #tpu.core_type<tc>, window_params = [{transform_indices = @transform_0, window_bounds = array<i64: 40, 256>}, {pipeline_mode = #tpu.pipeline_mode<synchronous>, transform_indices = @transform_1, window_bounds = array<i64: 256, 32>}, {pipeline_mode = #tpu.pipeline_mode<synchronous>, transform_indices = @transform_2, window_bounds = array<i64: 256, 16>}, {pipeline_mode = #tpu.pipeline_mode<synchronous>, transform_indices = @transform_3, window_bounds = array<i64: 32, 512>}, {pipeline_mode = #tpu.pipeline_mode<synchronous>, transform_indices = @transform_4, window_bounds = array<i64: 10, 40>}, {pipeline_mode = #tpu.pipeline_mode<synchronous>, transform_indices = @transform_5, window_bounds = array<i64: 10, 1>}, {pipeline_mode = #tpu.pipeline_mode<synchronous>, transform_indices = @transform_6, window_bounds = array<i64: 40, 10>}, {pipeline_mode = #tpu.pipeline_mode<synchronous>, transform_indices = @transform_7, window_bounds = array<i64: 40, 1>}, {transform_indices = @transform_8, window_bounds = array<i64: 40, 256>}]} {
    %c0 = arith.constant 0 : index
    %c0_0 = arith.constant 0 : index
    %0 = vector.load %arg1[%c0, %c0_0] : memref<40x256xf32, #tpu.memory_space<vmem>>, vector<40x256xf32>
    %c0_1 = arith.constant 0 : index
    %c0_2 = arith.constant 0 : index
    %1 = vector.load %arg2[%c0_1, %c0_2] : memref<256x32xf32, #tpu.memory_space<vmem>>, vector<256x32xf32>
    %cst = arith.constant dense<0.000000e+00> : vector<40x32xf32>
    %2 = tpu.matmul %0, %1, %cst {dimension_numbers = #tpu.dot_dimension_numbers<[1], [0], [0], [1], [0, 0, 1, 1], [], []>} : vector<40x256xf32>, vector<256x32xf32>, vector<40x32xf32> -> vector<40x32xf32>
    %3 = vector.extract_strided_slice %0 {offsets = [0, 0], sizes = [40, 128], strides = [1, 1]} : vector<40x256xf32> to vector<40x128xf32>
    %4 = vector.extract_strided_slice %0 {offsets = [0, 128], sizes = [40, 128], strides = [1, 1]} : vector<40x256xf32> to vector<40x128xf32>
    %5 = arith.maximumf %3, %4 : vector<40x128xf32>
    %6 = vector.extract_strided_slice %5 {offsets = [0, 0], sizes = [40, 64], strides = [1, 1]} : vector<40x128xf32> to vector<40x64xf32>
    %7 = vector.extract_strided_slice %5 {offsets = [0, 64], sizes = [40, 64], strides = [1, 1]} : vector<40x128xf32> to vector<40x64xf32>
    %8 = arith.maximumf %6, %7 : vector<40x64xf32>
    %9 = vector.extract_strided_slice %8 {offsets = [0, 0], sizes = [40, 32], strides = [1, 1]} : vector<40x64xf32> to vector<40x32xf32>
    %10 = vector.extract_strided_slice %8 {offsets = [0, 32], sizes = [40, 32], strides = [1, 1]} : vector<40x64xf32> to vector<40x32xf32>
    %11 = arith.maximumf %9, %10 : vector<40x32xf32>
    %12 = vector.extract_strided_slice %11 {offsets = [0, 0], sizes = [40, 16], strides = [1, 1]} : vector<40x32xf32> to vector<40x16xf32>
    %13 = vector.extract_strided_slice %11 {offsets = [0, 16], sizes = [40, 16], strides = [1, 1]} : vector<40x32xf32> to vector<40x16xf32>
    %14 = arith.maximumf %12, %13 : vector<40x16xf32>
    %15 = vector.extract_strided_slice %0 {offsets = [0, 1], sizes = [40, 255], strides = [1, 1]} : vector<40x256xf32> to vector<40x255xf32>
    %16 = vector.extract_strided_slice %0 {offsets = [0, 0], sizes = [40, 1], strides = [1, 1]} : vector<40x256xf32> to vector<40x1xf32>
    %17 = tpu.concatenate %15, %16 in 1 : vector<40x255xf32>, vector<40x1xf32> -> vector<40x256xf32>
    %18 = arith.maximumf %0, %17 : vector<40x256xf32>
    %19 = vector.extract_strided_slice %18 {offsets = [0, 2], sizes = [40, 254], strides = [1, 1]} : vector<40x256xf32> to vector<40x254xf32>
    %20 = vector.extract_strided_slice %18 {offsets = [0, 0], sizes = [40, 2], strides = [1, 1]} : vector<40x256xf32> to vector<40x2xf32>
    %21 = tpu.concatenate %19, %20 in 1 : vector<40x254xf32>, vector<40x2xf32> -> vector<40x256xf32>
    %22 = arith.maximumf %18, %21 : vector<40x256xf32>
    %23 = vector.extract_strided_slice %22 {offsets = [0, 4], sizes = [40, 252], strides = [1, 1]} : vector<40x256xf32> to vector<40x252xf32>
    %24 = vector.extract_strided_slice %22 {offsets = [0, 0], sizes = [40, 4], strides = [1, 1]} : vector<40x256xf32> to vector<40x4xf32>
    %25 = tpu.concatenate %23, %24 in 1 : vector<40x252xf32>, vector<40x4xf32> -> vector<40x256xf32>
    %26 = arith.maximumf %22, %25 : vector<40x256xf32>
    %27 = vector.extract_strided_slice %26 {offsets = [0, 8], sizes = [40, 248], strides = [1, 1]} : vector<40x256xf32> to vector<40x248xf32>
    %28 = vector.extract_strided_slice %26 {offsets = [0, 0], sizes = [40, 8], strides = [1, 1]} : vector<40x256xf32> to vector<40x8xf32>
    %29 = tpu.concatenate %27, %28 in 1 : vector<40x248xf32>, vector<40x8xf32> -> vector<40x256xf32>
    %30 = arith.maximumf %26, %29 : vector<40x256xf32>
    %c0_3 = arith.constant 0 : index
    %c0_4 = arith.constant 0 : index
    %31 = vector.load %arg3[%c0_3, %c0_4] : memref<256x16xf32, #tpu.memory_space<vmem>>, vector<256x16xf32>
    %cst_5 = arith.constant dense<0.000000e+00> : vector<40x16xf32>
    %32 = tpu.matmul %30, %31, %cst_5 {dimension_numbers = #tpu.dot_dimension_numbers<[1], [0], [0], [1], [0, 0, 1, 1], [], []>} : vector<40x256xf32>, vector<256x16xf32>, vector<40x16xf32> -> vector<40x16xf32>
    %33 = tpu.concatenate %2, %32, %14 in 1 : vector<40x32xf32>, vector<40x16xf32>, vector<40x16xf32> -> vector<40x64xf32>
    %c0_6 = arith.constant 0 : index
    %c0_7 = arith.constant 0 : index
    %34 = vector.load %arg5[%c0_6, %c0_7] : memref<10x40xf32, #tpu.memory_space<vmem>>, vector<10x40xf32>
    %cst_8 = arith.constant dense<0.000000e+00> : vector<10x64xf32>
    %35 = tpu.matmul %34, %33, %cst_8 {dimension_numbers = #tpu.dot_dimension_numbers<[1], [0], [0], [1], [0, 0, 1, 1], [], []>} : vector<10x40xf32>, vector<40x64xf32>, vector<10x64xf32> -> vector<10x64xf32>
    %c0_9 = arith.constant 0 : index
    %c0_10 = arith.constant 0 : index
    %36 = vector.load %arg6[%c0_9, %c0_10] : memref<10x1xf32, #tpu.memory_space<vmem>>, vector<10x1xf32>
    %37 = vector.broadcast %36 : vector<10x1xf32> to vector<10x64xf32>
    %38 = arith.addf %35, %37 : vector<10x64xf32>
    %cst_11 = arith.constant 0.000000e+00 : f32
    %39 = vector.broadcast %cst_11 : f32 to vector<10x64xf32>
    %40 = arith.maximumf %38, %39 : vector<10x64xf32>
    %c0_12 = arith.constant 0 : index
    %c0_13 = arith.constant 0 : index
    %41 = vector.load %arg7[%c0_12, %c0_13] : memref<40x10xf32, #tpu.memory_space<vmem>>, vector<40x10xf32>
    %cst_14 = arith.constant dense<0.000000e+00> : vector<40x64xf32>
    %42 = tpu.matmul %41, %40, %cst_14 {dimension_numbers = #tpu.dot_dimension_numbers<[1], [0], [0], [1], [0, 0, 1, 1], [], []>} : vector<40x10xf32>, vector<10x64xf32>, vector<40x64xf32> -> vector<40x64xf32>
    %c0_15 = arith.constant 0 : index
    %c0_16 = arith.constant 0 : index
    %43 = vector.load %arg8[%c0_15, %c0_16] : memref<40x1xf32, #tpu.memory_space<vmem>>, vector<40x1xf32>
    %44 = vector.broadcast %43 : vector<40x1xf32> to vector<40x64xf32>
    %45 = arith.addf %42, %44 : vector<40x64xf32>
    %46 = vector.extract_strided_slice %45 {offsets = [0, 0], sizes = [40, 32], strides = [1, 1]} : vector<40x64xf32> to vector<40x32xf32>
    %47 = vector.extract_strided_slice %45 {offsets = [0, 32], sizes = [40, 32], strides = [1, 1]} : vector<40x64xf32> to vector<40x32xf32>
    %48 = arith.addf %46, %47 : vector<40x32xf32>
    %49 = arith.negf %48 : vector<40x32xf32>
    %50 = math.exp %49 : vector<40x32xf32>
    %cst_17 = arith.constant 1.000000e+00 : f32
    %51 = vector.broadcast %cst_17 : f32 to vector<40x32xf32>
    %52 = arith.addf %51, %50 : vector<40x32xf32>
    %53 = arith.divf %51, %52 : vector<40x32xf32>
    %c0_18 = arith.constant 0 : index
    %c0_19 = arith.constant 0 : index
    %54 = vector.load %arg4[%c0_18, %c0_19] : memref<32x512xf32, #tpu.memory_space<vmem>>, vector<32x512xf32>
    %cst_20 = arith.constant dense<0.000000e+00> : vector<40x512xf32>
    %55 = tpu.matmul %53, %54, %cst_20 {dimension_numbers = #tpu.dot_dimension_numbers<[1], [0], [0], [1], [0, 0, 1, 1], [], []>} : vector<40x32xf32>, vector<32x512xf32>, vector<40x512xf32> -> vector<40x512xf32>
    %56 = vector.extract_strided_slice %55 {offsets = [0, 0], sizes = [40, 256], strides = [1, 1]} : vector<40x512xf32> to vector<40x256xf32>
    %57 = vector.extract_strided_slice %55 {offsets = [0, 256], sizes = [40, 256], strides = [1, 1]} : vector<40x512xf32> to vector<40x256xf32>
    %58 = arith.mulf %56, %57 : vector<40x256xf32>
    %59 = arith.mulf %0, %58 : vector<40x256xf32>
    %c0_21 = arith.constant 0 : index
    %c0_22 = arith.constant 0 : index
    %60 = vector.load %arg9[%c0_21, %c0_22] : memref<40x256xf32, #tpu.memory_space<vmem>>, vector<40x256xf32>
    tpu.vector_store %arg9[%c0_21, %c0_22], %59 {strides = array<i32>} : memref<40x256xf32, #tpu.memory_space<vmem>>, vector<40x256xf32>,
    return
  }
  func.func @transform_0(%arg0: i32) -> (i32, i32) {
    %c0_i32 = arith.constant 0 : i32
    %c0_i32_0 = arith.constant 0 : i32
    return %arg0, %c0_i32 : i32, i32
  }
  func.func @transform_1(%arg0: i32) -> (i32, i32) {
    %c0_i32 = arith.constant 0 : i32
    %c0_i32_0 = arith.constant 0 : i32
    %c0_i32_1 = arith.constant 0 : i32
    return %c0_i32, %c0_i32_0 : i32, i32
  }
  func.func @transform_2(%arg0: i32) -> (i32, i32) {
    %c0_i32 = arith.constant 0 : i32
    %c0_i32_0 = arith.constant 0 : i32
    %c0_i32_1 = arith.constant 0 : i32
    return %c0_i32, %c0_i32_0 : i32, i32
  }
  func.func @transform_3(%arg0: i32) -> (i32, i32) {
    %c0_i32 = arith.constant 0 : i32
    %c0_i32_0 = arith.constant 0 : i32
    %c0_i32_1 = arith.constant 0 : i32
    return %c0_i32, %c0_i32_0 : i32, i32
  }
  func.func @transform_4(%arg0: i32) -> (i32, i32) {
    %c0_i32 = arith.constant 0 : i32
    %c0_i32_0 = arith.constant 0 : i32
    %c0_i32_1 = arith.constant 0 : i32
    return %c0_i32, %c0_i32_0 : i32, i32
  }
  func.func @transform_5(%arg0: i32) -> (i32, i32) {
    %c0_i32 = arith.constant 0 : i32
    %c0_i32_0 = arith.constant 0 : i32
    %c0_i32_1 = arith.constant 0 : i32
    return %c0_i32, %c0_i32_0 : i32, i32
  }
  func.func @transform_6(%arg0: i32) -> (i32, i32) {
    %c0_i32 = arith.constant 0 : i32
    %c0_i32_0 = arith.constant 0 : i32
    %c0_i32_1 = arith.constant 0 : i32
    return %c0_i32, %c0_i32_0 : i32, i32
  }
  func.func @transform_7(%arg0: i32) -> (i32, i32) {
    %c0_i32 = arith.constant 0 : i32
    %c0_i32_0 = arith.constant 0 : i32
    %c0_i32_1 = arith.constant 0 : i32
    return %c0_i32, %c0_i32_0 : i32, i32
  }
  func.func @transform_8(%arg0: i32) -> (i32, i32) {
    %c0_i32 = arith.constant 0 : i32
    %c0_i32_0 = arith.constant 0 : i32
    return %arg0, %c0_i32 : i32, i32
  }
}

</mosaic_0001>

<bundles_post_ra>
// kernel: tpu_custom_call.1
= control target key start
LH: loop header
LB: loop body
LE: loop exit
PB: predicated region body
PF: predicated region fallthrough
CT: control target
= control target key end

     0   :  { %13 = vsyncpa [#allocation3], 0  ;;  %s2758_s0 = inlined_call_operand.vmem [shape: f32[80,256], index: 0, kind: input, shape index: {}]   ;;  %s2759_s1 = inlined_call_operand.vmem [shape: f32[256,32], index: 1, kind: input, shape index: {}]   ;;  %s2760_s2 = inlined_call_operand.vmem [shape: f32[256,16], index: 2, kind: input, shape index: {}]   ;;  %s2761_s3 = inlined_call_operand.vmem [shape: f32[32,512], index: 3, kind: input, shape index: {}]   ;;  %s2762_s4 = inlined_call_operand.vmem [shape: f32[10,40], index: 4, kind: input, shape index: {}]   ;;  %s2763_s5 = inlined_call_operand.vmem [shape: f32[10,1], index: 5, kind: input, shape index: {}]   ;;  %s2764_s6 = inlined_call_operand.vmem [shape: f32[40,10], index: 6, kind: input, shape index: {}]   ;;  %s2765_s7 = inlined_call_operand.vmem [shape: f32[40,1], index: 7, kind: input, shape index: {}]   ;;  %s2766_s8 = inlined_call_operand.hbm [shape: f32[80,256], index: 8, kind: output, shape index: {}]  }
   0x1   :  { %15 = vsyncpa [#allocation3 + $0x1], 0  ;;  %s2075_s27 = smov 0   ;;  %s2077_s28 = smov 0  }
   0x2   :  { %s2079_s29 = smov 0   ;;  %s2081_s30 = smov 0  }
   0x3 LB: > { %s2096_s9 = sadd.s32 4294967295, %s2013_s30   ;;  %s1586_s10 = sadd.s32 4294967294, %s2013_s30   ;;  %s2013_s30 = sphi %s2081_s30, %s2772_s30   ;;  %s2009_s29 = sphi %s2079_s29, %s2771_s29   ;;  %s2005_s28 = sphi %s2077_s28, %s2770_s28   ;;  %s2001_s27 = sphi %s2075_s27, %s2769_s27  }
   0x4   : > { %s2100_s11 = sadd.s32 1, %s2013_s30   ;;  %s201_s12 = sadd.s32 1, %s2009_s29 }
   0x5   : > { %s198_s13 = ssub.s32 %s2013_s30, %s2100_s11  ;;  %p211_p0 = scmp.ne.s32.totalorder %s2009_s29, %s2005_s28 }
   0x6   : > { %p199_p1 = scmp.eq.s32.totalorder %s198_s13, 0  ;;  %p212_p2 = scmp.eq.s32.totalorder %s2096_s9, 1 }
   0x7   : > { %p217_p3 = scmp.ne.s32.totalorder %s2005_s28, %s2001_s27  ;;  %p218_p4 = scmp.eq.s32.totalorder %s1586_s10, 1 }
   0x8   : > { %s2111_s14 = scalar_select %p199_p1, %s2009_s29, %s201_s12  }
   0x9   : > { %p2113_p5 = por %p212_p2, %p211_p0  ;;  %p2117_p6 = por %p218_p4, %p217_p3 }
   0xa   : > { %p1589_p7 = scmp.ge.s32.totalorder %s2013_s30, 1  ;;  %p267_p8 = scmp.lt.s32.totalorder %s2013_s30, 3 }
   0xc   : > { %p268_p9 = pnand %p1589_p7, %p267_p8 }
   0xd   : > { %s302_s17 = smul.u32 (!%p268_p9), 5, %s2096_s9  ;;  %s2015_s22 = smov (!%p268_p9), 127  }
   0xe   : > { %271 = sbr.rel (%p268_p9) target bundleno = 1663 (0x67f), region = 52  ;;  %s2016_s23 = smov (!%p268_p9), 126  }
   0xf   : > { %p303_p10 = scmp.lt.s32.totalorder (!%p268_p9), %s302_s17, 9  ;;  %s2017_s24 = smov (!%p268_p9), 124  }
  0x10   : > { %s2018_s13 = smov (!%p268_p9), 120   ;;  %s2019_s26 = smov (!%p268_p9), 64  }
  0x11   : > { %s2021_s25 = smov (!%p268_p9), 112   ;;  %s2023_s10 = smov (!%p268_p9), 48  }
  0x13   : > { %s2774_s17 = smov (!%p303_p10, %s302_s17), 9  ;;  %vm552_vm0 = vcmask 1039360   ;;  %vm618_vm1 = vcmask 1031168   ;;  %vm684_vm2 = vcmask 1014784   ;;  %vm750_vm3 = vcmask 982016  }
  0x14   : > { %s1619_s18 = sshll.u32 %s2774_s17, 4  ;;  %vm974_vm4 = vcmask 326656   ;;  %vm954_vm5 = vcmask 392192   ;;  %vm948_vm6 = vcmask 261120   ;;  %vm2026_vm7 = vmmov 0  }
  0x15   : > { %s2127_s21 = scalar_lea.vmem %s2758_s0, %s1619_s18  ;;  %vm1109_vm8 = vcmask 1041408   ;;  %vm1093_vm9 = vcmask 80896  }
  0x16   : > { %v2130_v0 = vld [vmem:[%s2127_s21] sm:$0xff]  ;;  %v2133_v1 = vld [vmem:[%s2127_s21 + $0x8] sm:$0xff]  ;;  %v2144_v5 = vld [vmem:[%s2127_s21 + $0x10] sm:$0xff] }
  0x17   : > { %v2136_v2 = vld [vmem:[%s2127_s21 + $0x20] sm:$0xff]  ;;  %v1821_v3 = vpack.i.bf16 %v2133_v1, %v2130_v0  ;;  %v2141_v4 = vld [vmem:[%s2127_s21 + $0x28] sm:$0xff]  ;;  %v2147_v6 = vld [vmem:[%s2127_s21 + $0x18] sm:$0xff]  ;;  %416 = vmatprep.mubr.f32.mxu0 %v2133_v1 }
  0x18   : > { %v1831_v7 = vpack.i.bf16 %v2141_v4, %v2136_v2  ;;  %v2153_v8 = vld [vmem:[%s2127_s21 + $0x30] sm:$0xff]  ;;  %v2156_v9 = vld [vmem:[%s2127_s21 + $0x38] sm:$0xff]  ;;  %v1826_v10 = vpack.i.bf16 %v2147_v6, %v2144_v5  ;;  %v2163_v12 = vld [vmem:[%s2127_s21 + $0x40] sm:$0xff] }
  0x19   : > { %1822 = vrot.lane.b32.xlu0 %v1821_v3, %s2015_s22  ;;  %v1836_v11 = vpack.i.bf16 %v2156_v9, %v2153_v8  ;;  %v2166_v13 = vld [vmem:[%s2127_s21 + $0x48] sm:$0xff] }
  0x1a   : > { %1832 = vrot.lane.b32.xlu1 %v1831_v7, %s2015_s22  ;;  %v1841_v14 = vpack.i.bf16 %v2166_v13, %v2163_v12 }
  0x1d   : > { %1827 = vrot.lane.b32.xlu0 %v1826_v10, %s2015_s22 }
  0x1e   : > { %1837 = vrot.lane.b32.xlu1 %v1836_v11, %s2015_s22 }
  0x21   : > { %1842 = vrot.lane.b32.xlu0 %v1841_v14, %s2015_s22 }
  0x8b   : > { %v1823_v15 = vpop.permute.xlu0 %1822 }
  0x8c   : > { %v1825_v16 = vunpack.i.h.bf16 %v1823_v15  ;;  %v1824_v17 = vunpack.i.l.bf16 %v1823_v15  ;;  %v1833_v18 = vpop.permute.xlu1 %1832 }
  0x8d   : > { %v1835_v19 = vunpack.i.h.bf16 %v1833_v18  ;;  %v1834_v20 = vunpack.i.l.bf16 %v1833_v18 }
  0x8e   : > { %v553_v21 = vsel %vm552_vm0, %v1824_v17, %v1825_v16  ;;  %v573_v22 = vsel %vm552_vm0, %v1825_v16, %v1824_v17 }
  0x8f   : > { %v555_v23 = vsel %vm552_vm0, %v1834_v20, %v1835_v19  ;;  %v575_v24 = vsel %vm552_vm0, %v1835_v19, %v1834_v20  ;;  %v1828_v25 = vpop.permute.xlu0 %1827  ;;  %v578_v26 = vmax.f32 %v2130_v0, %v553_v21  ;;  %v579_v27 = vmax.f32 %v2133_v1, %v573_v22 }
  0x90   : > { %v1830_v28 = vunpack.i.h.bf16 %v1828_v25  ;;  %v1829_v29 = vunpack.i.l.bf16 %v1828_v25  ;;  %v1838_v30 = vpop.permute.xlu1 %1837  ;;  %v582_v31 = vmax.f32 %v2136_v2, %v555_v23  ;;  %v583_v32 = vmax.f32 %v2141_v4, %v575_v24 }
  0x91   : > { %v1840_v33 = vunpack.i.h.bf16 %v1838_v30  ;;  %v1839_v34 = vunpack.i.l.bf16 %v1838_v30  ;;  %v1846_v35 = vpack.i.bf16 %v579_v27, %v578_v26 }
  0x92   : > { %v554_v36 = vsel %vm552_vm0, %v1829_v29, %v1830_v28  ;;  %v574_v37 = vsel %vm552_vm0, %v1830_v28, %v1829_v29  ;;  %v1856_v38 = vpack.i.bf16 %v583_v32, %v582_v31 }
  0x93   : > { %v556_v39 = vsel %vm552_vm0, %v1839_v34, %v1840_v33  ;;  %v576_v40 = vsel %vm552_vm0, %v1840_v33, %v1839_v34  ;;  %v1843_v41 = vpop.permute.xlu0 %1842  ;;  %1847 = vrot.lane.b32.xlu1 %v1846_v35, %s2016_s23  ;;  %v580_v42 = vmax.f32 %v2144_v5, %v554_v36  ;;  %v581_v43 = vmax.f32 %v2147_v6, %v574_v37 }
  0x94   : > { %v1845_v44 = vunpack.i.h.bf16 %v1843_v41  ;;  %v1844_v45 = vunpack.i.l.bf16 %v1843_v41  ;;  %v584_v46 = vmax.f32 %v2153_v8, %v556_v39  ;;  %v585_v47 = vmax.f32 %v2156_v9, %v576_v40  ;;  %v817_v41 = vld [vmem:[%s2760_s2 + $0xf8] sm:$0xff] }
  0x95   : > { %v1851_v48 = vpack.i.bf16 %v581_v43, %v580_v42  ;;  %1670 = vmatprep.subr.mxu1 %v817_v41 }
  0x96   : > { %v557_v49 = vsel %vm552_vm0, %v1844_v45, %v1845_v44  ;;  %v577_v50 = vsel %vm552_vm0, %v1845_v44, %v1844_v45  ;;  %v1861_v51 = vpack.i.bf16 %v585_v47, %v584_v46  ;;  %v800_v44 = vld [vmem:[%s2760_s2 + $0x70] sm:$0xff]  ;;  %v815_v45 = vld [vmem:[%s2760_s2 + $0xe8] sm:$0xff] }
  0x97   : > { %1852 = vrot.lane.b32.xlu0 %v1851_v48, %s2016_s23  ;;  %1857 = vrot.lane.b32.xlu1 %v1856_v38, %s2016_s23  ;;  %v586_v52 = vmax.f32 %v2163_v12, %v557_v49  ;;  %v587_v53 = vmax.f32 %v2166_v13, %v577_v50  ;;  %v798_v48 = vld [vmem:[%s2760_s2 + $0x60] sm:$0xff]  ;;  %v813_v49 = vld [vmem:[%s2760_s2 + $0xd8] sm:$0xff] }
  0x98   : > { %v797_v50 = vld [vmem:[%s2760_s2 + $0x58] sm:$0xff] }
  0x99   : > { %v1866_v54 = vpack.i.bf16 %v587_v53, %v586_v52 }
  0x9b   : > { %1862 = vrot.lane.b32.xlu0 %v1861_v51, %s2016_s23  ;;  %1867 = vrot.lane.b32.xlu1 %v1866_v54, %s2016_s23  ;;  %v812_v51 = vld [vmem:[%s2760_s2 + $0xd0] sm:$0xff]  ;;  %v795_v54 = vld [vmem:[%s2760_s2 + $0x48] sm:$0xff] }
 0x105   : > { %v1848_v55 = vpop.permute.xlu1 %1847 }
 0x106   : > { %v1850_v56 = vunpack.i.h.bf16 %v1848_v55  ;;  %v1849_v57 = vunpack.i.l.bf16 %v1848_v55  ;;  %v810_v55 = vld [vmem:[%s2760_s2 + $0xc0] sm:$0xff] }
 0x108   : > { %v619_v58 = vsel %vm618_vm1, %v1849_v57, %v1850_v56  ;;  %v639_v59 = vsel %vm618_vm1, %v1850_v56, %v1849_v57  ;;  %v794_v56 = vld [vmem:[%s2760_s2 + $0x40] sm:$0xff]  ;;  %v809_v57 = vld [vmem:[%s2760_s2 + $0xb8] sm:$0xff] }
 0x109   : > { %v1853_v60 = vpop.permute.xlu0 %1852  ;;  %v1858_v61 = vpop.permute.xlu1 %1857  ;;  %v2192_v62 = vmax.f32 %v578_v26, %v619_v58  ;;  %v2194_v63 = vmax.f32 %v579_v27, %v639_v59  ;;  %v793_v58 = vld [vmem:[%s2760_s2 + $0x38] sm:$0xff]  ;;  %v808_v59 = vld [vmem:[%s2760_s2 + $0xb0] sm:$0xff] }
 0x10a   : > { %v1855_v3 = vunpack.i.h.bf16 %v1853_v60  ;;  %v1854_v7 = vunpack.i.l.bf16 %v1853_v60  ;;  %v1860_v10 = vunpack.i.h.bf16 %v1858_v61  ;;  %v1859_v11 = vunpack.i.l.bf16 %v1858_v61  ;;  %v792_v60 = vld [vmem:[%s2760_s2 + $0x30] sm:$0xff]  ;;  %v807_v61 = vld [vmem:[%s2760_s2 + $0xa8] sm:$0xff] }
 0x10b   : > { %v1871_v14 = vpack.i.bf16 %v2194_v63, %v2192_v62 }
 0x10c   : > { %v620_v15 = vsel %vm618_vm1, %v1854_v7, %v1855_v3  ;;  %v640_v16 = vsel %vm618_vm1, %v1855_v3, %v1854_v7  ;;  %v621_v17 = vsel %vm618_vm1, %v1859_v11, %v1860_v10  ;;  %v641_v18 = vsel %vm618_vm1, %v1860_v10, %v1859_v11  ;;  %v791_v3 = vld [vmem:[%s2760_s2 + $0x28] sm:$0xff]  ;;  %v806_v7 = vld [vmem:[%s2760_s2 + $0xa0] sm:$0xff]  ;;  %v805_v11 = vld [vmem:[%s2760_s2 + $0x98] sm:$0xff] }
 0x10d   : > { %v1863_v19 = vpop.permute.xlu0 %1862  ;;  %v1868_v20 = vpop.permute.xlu1 %1867  ;;  %1872 = vrot.lane.b32.xlu0 %v1871_v14, %s2017_s24  ;;  %v2202_v21 = vmax.f32 %v580_v42, %v620_v15  ;;  %v2204_v22 = vmax.f32 %v581_v43, %v640_v16  ;;  %v2206_v23 = vmax.f32 %v582_v31, %v621_v17  ;;  %v2208_v24 = vmax.f32 %v583_v32, %v641_v18  ;;  %v801_v42 = vld [vmem:[%s2760_s2 + $0x78] sm:$0xff]  ;;  %v816_v43 = vld [vmem:[%s2760_s2 + $0xf0] sm:$0xff]  ;;  %v790_v10 = vld [vmem:[%s2760_s2 + $0x20] sm:$0xff] }
 0x10e   : > { %v1865_v25 = vunpack.i.h.bf16 %v1863_v19  ;;  %v1864_v26 = vunpack.i.l.bf16 %v1863_v19  ;;  %v1870_v27 = vunpack.i.h.bf16 %v1868_v20  ;;  %v1869_v28 = vunpack.i.l.bf16 %v1868_v20  ;;  %1671 = vmatpush3.msra.mxu1 %v801_v42  ;;  %v789_v14 = vld [vmem:[%s2760_s2 + $0x18] sm:$0xff]  ;;  %v804_v15 = vld [vmem:[%s2760_s2 + $0x90] sm:$0xff]  ;;  %v803_v17 = vld [vmem:[%s2760_s2 + $0x88] sm:$0xff] }
 0x10f   : > { %v1876_v29 = vpack.i.bf16 %v2204_v22, %v2202_v21  ;;  %v1881_v30 = vpack.i.bf16 %v2208_v24, %v2206_v23  ;;  %1672 = vmatprep.subr.mxu1 %v816_v43  ;;  %v788_v16 = vld [vmem:[%s2760_s2 + $0x10] sm:$0xff]  ;;  %v787_v18 = vld [vmem:[%s2760_s2 + $0x8] sm:$0xff]  ;;  %v802_v19 = vld [vmem:[%s2760_s2 + $0x80] sm:$0xff] }
 0x110   : > { %v622_v33 = vsel %vm618_vm1, %v1864_v26, %v1865_v25  ;;  %v642_v34 = vsel %vm618_vm1, %v1865_v25, %v1864_v26  ;;  %v623_v35 = vsel %vm618_vm1, %v1869_v28, %v1870_v27  ;;  %v643_v31 = vsel %vm618_vm1, %v1870_v27, %v1869_v28  ;;  %1673 = vmatpush3.msra.mxu1 %v800_v44  ;;  %v786_v20 = vld [vmem:[%s2760_s2] sm:$0xff] }
 0x111   : > { %1877 = vrot.lane.b32.xlu1 %v1876_v29, %s2017_s24  ;;  %1882 = vrot.lane.b32.xlu0 %v1881_v30, %s2017_s24  ;;  %v2218_v32 = vmax.f32 %v584_v46, %v622_v33  ;;  %v2220_v36 = vmax.f32 %v585_v47, %v642_v34  ;;  %v2222_v37 = vmax.f32 %v586_v52, %v623_v35  ;;  %v799_v46 = vld [vmem:[%s2760_s2 + $0x68] sm:$0xff]  ;;  %v814_v47 = vld [vmem:[%s2760_s2 + $0xe0] sm:$0xff] }
 0x112   : > { %v2224_v38 = vmax.f32 %v587_v53, %v643_v31  ;;  %1674 = vmatprep.subr.mxu1 %v815_v45  ;;  %v796_v52 = vld [vmem:[%s2760_s2 + $0x50] sm:$0xff]  ;;  %v811_v53 = vld [vmem:[%s2760_s2 + $0xc8] sm:$0xff] }
 0x113   : > { %v1886_v39 = vpack.i.bf16 %v2220_v36, %v2218_v32  ;;  %1675 = vmatpush3.msra.mxu1 %v799_v46 }
 0x114   : > { %v1891_v40 = vpack.i.bf16 %v2224_v38, %v2222_v37  ;;  %1676 = vmatprep.subr.mxu1 %v814_v47 }
 0x115   : > { %1887 = vrot.lane.b32.xlu1 %v1886_v39, %s2017_s24  ;;  %1677 = vmatpush3.msra.mxu1 %v798_v48 }
 0x116   : > { %1892 = vrot.lane.b32.xlu0 %v1891_v40, %s2017_s24  ;;  %1678 = vmatprep.subr.mxu1 %v813_v49  ;;  %s2020_s24 = smov 96  }
 0x117   : > { %1679 = vmatpush3.msra.mxu1 %v797_v50 }
 0x118   : > { %1680 = vmatprep.subr.mxu1 %v812_v51 }
 0x119   : > { %1681 = vmatpush3.msra.mxu1 %v796_v52 }
 0x11a   : > { %1682 = vmatprep.subr.mxu1 %v811_v53 }
 0x11b   : > { %1683 = vmatpush3.msra.mxu1 %v795_v54 }
 0x11c   : > { %1684 = vmatprep.subr.mxu1 %v810_v55 }
 0x11d   : > { %1685 = vmatpush3.msra.mxu1 %v794_v56 }
 0x11e   : > { %1686 = vmatprep.subr.mxu1 %v809_v57 }
 0x11f   : > { %1687 = vmatpush3.msra.mxu1 %v793_v58 }
 0x120   : > { %1688 = vmatprep.subr.mxu1 %v808_v59 }
 0x121   : > { %1689 = vmatpush3.msra.mxu1 %v792_v60 }
 0x122   : > { %1690 = vmatprep.subr.mxu1 %v807_v61 }
 0x123   : > { %1691 = vmatpush3.msra.mxu1 %v791_v3 }
 0x124   : > { %1692 = vmatprep.subr.mxu1 %v806_v7  ;;  %v350_v7 = vld [vmem:[%s2759_s1 + $0xf0] sm:$0xff] }
 0x125   : > { %1693 = vmatpush3.msra.mxu1 %v790_v10  ;;  %v334_v10 = vld [vmem:[%s2759_s1 + $0x70] sm:$0xff] }
 0x126   : > { %1694 = vmatprep.subr.mxu1 %v805_v11  ;;  %v2400_v11 = vmax.f32 %v2136_v2, %v2141_v4 }
 0x127   : > { %1695 = vmatpush3.msra.mxu1 %v789_v14  ;;  %v2404_v14 = vmax.f32 %v2144_v5, %v2147_v6 }
 0x128   : > { %1696 = vmatprep.subr.mxu1 %v804_v15  ;;  %v349_v15 = vld [vmem:[%s2759_s1 + $0xe8] sm:$0xff] }
 0x129   : > { %1697 = vmatpush3.msra.mxu1 %v788_v16  ;;  %v333_v16 = vld [vmem:[%s2759_s1 + $0x68] sm:$0xff] }
 0x12a   : > { %1698 = vmatprep.subr.mxu1 %v803_v17  ;;  %v348_v17 = vld [vmem:[%s2759_s1 + $0xe0] sm:$0xff] }
 0x12b   : > { %1699 = vmatpush3.msra.mxu1 %v787_v18  ;;  %v2419_v18 = vmax.f32 %v2130_v0, %v2133_v1  ;;  %v346_v1 = vld [vmem:[%s2759_s1 + $0xd0] sm:$0xff] }
 0x12c   : > { %1700 = vmatprep.subr.mxu1 %v802_v19  ;;  %v332_v19 = vld [vmem:[%s2759_s1 + $0x60] sm:$0xff] }
 0x12d   : > { %1701 = vmatpush3.msra.mxu1 %v786_v20  ;;  %v347_v20 = vld [vmem:[%s2759_s1 + $0xd8] sm:$0xff] }
 0x17f   : > { %v1873_v25 = vpop.permute.xlu0 %1872 }
 0x180   : > { %v1875_v26 = vunpack.i.h.bf16 %v1873_v25  ;;  %v1874_v27 = vunpack.i.l.bf16 %v1873_v25  ;;  %v331_v25 = vld [vmem:[%s2759_s1 + $0x58] sm:$0xff] }
 0x182   : > { %v685_v28 = vsel %vm684_vm2, %v1874_v27, %v1875_v26  ;;  %v705_v29 = vsel %vm684_vm2, %v1875_v26, %v1874_v27  ;;  %v330_v26 = vld [vmem:[%s2759_s1 + $0x50] sm:$0xff]  ;;  %v345_v27 = vld [vmem:[%s2759_s1 + $0xc8] sm:$0xff] }
 0x183   : > { %v1878_v30 = vpop.permute.xlu1 %1877  ;;  %v1883_v33 = vpop.permute.xlu0 %1882  ;;  %v2329_v34 = vmax.f32 %v2192_v62, %v685_v28  ;;  %v2332_v35 = vmax.f32 %v2194_v63, %v705_v29  ;;  %v329_v28 = vld [vmem:[%s2759_s1 + $0x48] sm:$0xff]  ;;  %v344_v29 = vld [vmem:[%s2759_s1 + $0xc0] sm:$0xff] }
 0x184   : > { %v1880_v31 = vunpack.i.h.bf16 %v1878_v30  ;;  %v1879_v39 = vunpack.i.l.bf16 %v1878_v30  ;;  %v1885_v40 = vunpack.i.h.bf16 %v1883_v33  ;;  %v1884_v41 = vunpack.i.l.bf16 %v1883_v33  ;;  %v328_v30 = vld [vmem:[%s2759_s1 + $0x40] sm:$0xff]  ;;  %v343_v33 = vld [vmem:[%s2759_s1 + $0xb8] sm:$0xff] }
 0x185   : > { %v1896_v42 = vpack.i.bf16 %v2332_v35, %v2329_v34 }
 0x186   : > { %v686_v43 = vsel %vm684_vm2, %v1879_v39, %v1880_v31  ;;  %v706_v44 = vsel %vm684_vm2, %v1880_v31, %v1879_v39  ;;  %v687_v45 = vsel %vm684_vm2, %v1884_v41, %v1885_v40  ;;  %v707_v46 = vsel %vm684_vm2, %v1885_v40, %v1884_v41  ;;  %v327_v31 = vld [vmem:[%s2759_s1 + $0x38] sm:$0xff]  ;;  %v342_v39 = vld [vmem:[%s2759_s1 + $0xb0] sm:$0xff]  ;;  %v341_v41 = vld [vmem:[%s2759_s1 + $0xa8] sm:$0xff] }
 0x187   : > { %v1888_v62 = vpop.permute.xlu1 %1887  ;;  %1897 = vrot.lane.b32.xlu1 %v1896_v42, %s2018_s13  ;;  %v2341_v63 = vmax.f32 %v2202_v21, %v686_v43  ;;  %v2344_v47 = vmax.f32 %v2204_v22, %v706_v44  ;;  %v2347_v48 = vmax.f32 %v2206_v23, %v687_v45  ;;  %v2350_v49 = vmax.f32 %v2208_v24, %v707_v46  ;;  %v326_v40 = vld [vmem:[%s2759_s1 + $0x30] sm:$0xff]  ;;  %v325_v42 = vld [vmem:[%s2759_s1 + $0x28] sm:$0xff]  ;;  %v340_v43 = vld [vmem:[%s2759_s1 + $0xa0] sm:$0xff] }
 0x188   : > { %v1890_v50 = vunpack.i.h.bf16 %v1888_v62  ;;  %v1889_v51 = vunpack.i.l.bf16 %v1888_v62  ;;  %v1893_v52 = vpop.permute.xlu0 %1892  ;;  %v324_v44 = vld [vmem:[%s2759_s1 + $0x20] sm:$0xff]  ;;  %v339_v45 = vld [vmem:[%s2759_s1 + $0x98] sm:$0xff]  ;;  %v338_v62 = vld [vmem:[%s2759_s1 + $0x90] sm:$0xff] }
 0x189   : > { %v1895_v53 = vunpack.i.h.bf16 %v1893_v52  ;;  %v1894_v54 = vunpack.i.l.bf16 %v1893_v52  ;;  %v1901_v55 = vpack.i.bf16 %v2344_v47, %v2341_v63  ;;  %v1906_v21 = vpack.i.bf16 %v2350_v49, %v2347_v48  ;;  %v323_v46 = vld [vmem:[%s2759_s1 + $0x18] sm:$0xff]  ;;  %v321_v52 = vld [vmem:[%s2759_s1 + $0x8] sm:$0xff] }
 0x18a   : > { %v688_v22 = vsel %vm684_vm2, %v1889_v51, %v1890_v50  ;;  %v708_v56 = vsel %vm684_vm2, %v1890_v50, %v1889_v51  ;;  %v322_v50 = vld [vmem:[%s2759_s1 + $0x10] sm:$0xff]  ;;  %v337_v51 = vld [vmem:[%s2759_s1 + $0x88] sm:$0xff] }
 0x18b   : > { %v689_v23 = vsel %vm684_vm2, %v1894_v54, %v1895_v53  ;;  %v709_v24 = vsel %vm684_vm2, %v1895_v53, %v1894_v54  ;;  %1902 = vrot.lane.b32.xlu0 %v1901_v55, %s2018_s13  ;;  %1907 = vrot.lane.b32.xlu1 %v1906_v21, %s2018_s13  ;;  %v2361_v57 = vmax.f32 %v2218_v32, %v688_v22  ;;  %v336_v53 = vld [vmem:[%s2759_s1 + $0x80] sm:$0xff] }
 0x18c   : > { %v2364_v58 = vmax.f32 %v2220_v36, %v708_v56  ;;  %v2367_v59 = vmax.f32 %v2222_v37, %v689_v23  ;;  %v2370_v60 = vmax.f32 %v2224_v38, %v709_v24  ;;  %v2378_v32 = vmax.f32 %v2163_v12, %v2166_v13  ;;  %v351_v37 = vld [vmem:[%s2759_s1 + $0xf8] sm:$0xff]  ;;  %v320_v54 = vld [vmem:[%s2759_s1] sm:$0xff] }
 0x18d   : > { %v2382_v36 = vmax.f32 %v2153_v8, %v2156_v9  ;;  %v335_v38 = vld [vmem:[%s2759_s1 + $0x78] sm:$0xff]  ;;  %1623 = vmatprep.subr.mxu0 %v351_v37 }
 0x18e   : > { %v1911_v61 = vpack.i.bf16 %v2364_v58, %v2361_v57  ;;  %v1916_v3 = vpack.i.bf16 %v2370_v60, %v2367_v59  ;;  %1624 = vmatpush3.msra.mxu0 %v335_v38 }
 0x18f   : > { %1625 = vmatprep.subr.mxu0 %v350_v7 }
 0x190   : > { %1912 = vrot.lane.b32.xlu0 %v1911_v61, %s2018_s13  ;;  %1917 = vrot.lane.b32.xlu1 %v1916_v3, %s2018_s13  ;;  %s2027_s13 = smov [#allocation2]  }
 0x191   : > { %1626 = vmatpush3.msra.mxu0 %v334_v10  ;;  %s1957_s17 = sshll.u32 %s2027_s13, 4  ;;  %s1958_s17 = int_to_ptr.vmem [resolvable:$false] %s1957_s17 }
 0x192   : > { %1627 = vmatprep.subr.mxu0 %v349_v15  ;;  %s1959_s18 = scalar_lea.vmem %s1958_s17, 2560 }
 0x193   : > { %1628 = vmatpush3.msra.mxu0 %v333_v16 }
 0x194   : > { %460 = vrot.lane.b32.xlu0 %v2378_v32, %s2019_s26  ;;  %458 = vrot.lane.b32.xlu1 %v2382_v36, %s2019_s26 }
 0x195   : > { %1629 = vmatprep.subr.mxu0 %v348_v17 }
 0x196   : > { %1630 = vmatpush3.msra.mxu0 %v332_v19 }
 0x197   : > { %1631 = vmatprep.subr.mxu0 %v347_v20 }
 0x198   : > { %456 = vrot.lane.b32.xlu0 %v2400_v11, %s2019_s26  ;;  %454 = vrot.lane.b32.xlu1 %v2404_v14, %s2019_s26 }
 0x199   : > { %1632 = vmatpush3.msra.mxu0 %v331_v25 }
 0x19a   : > { %1633 = vmatprep.subr.mxu0 %v346_v1 }
 0x19b   : > { %1634 = vmatpush3.msra.mxu0 %v330_v26 }
 0x19c   : > { %452 = vrot.lane.b32.xlu0 %v2419_v18, %s2019_s26  ;;  %1635 = vmatprep.subr.mxu0 %v345_v27  ;;  %s2022_s26 = smov 32  }
 0x19d   : > { %1636 = vmatpush3.msra.mxu0 %v329_v28 }
 0x19e   : > { %1637 = vmatprep.subr.mxu0 %v344_v29 }
 0x19f   : > { %1638 = vmatpush3.msra.mxu0 %v328_v30 }
 0x1a0   : > { %1639 = vmatprep.subr.mxu0 %v343_v33 }
 0x1a1   : > { %1640 = vmatpush3.msra.mxu0 %v327_v31 }
 0x1a2   : > { %1641 = vmatprep.subr.mxu0 %v342_v39 }
 0x1a3   : > { %1642 = vmatpush3.msra.mxu0 %v326_v40 }
 0x1a4   : > { %1643 = vmatprep.subr.mxu0 %v341_v41 }
 0x1a5   : > { %1644 = vmatpush3.msra.mxu0 %v325_v42 }
 0x1a6   : > { %1645 = vmatprep.subr.mxu0 %v340_v43 }
 0x1a7   : > { %1646 = vmatpush3.msra.mxu0 %v324_v44 }
 0x1a8   : > { %1647 = vmatprep.subr.mxu0 %v339_v45 }
 0x1a9   : > { %1648 = vmatpush3.msra.mxu0 %v323_v46 }
 0x1aa   : > { %1649 = vmatprep.subr.mxu0 %v338_v62 }
 0x1ab   : > { %1650 = vmatpush3.msra.mxu0 %v322_v50 }
 0x1ac   : > { %1651 = vmatprep.subr.mxu0 %v337_v51 }
 0x1ad   : > { %1652 = vmatpush3.msra.mxu0 %v321_v52 }
 0x1ae   : > { %1653 = vmatprep.subr.mxu0 %v336_v53 }
 0x1af   : > { %1654 = vmatpush3.msra.mxu0 %v320_v54 }
 0x1b0   : > { %417 = vmatmul.mubr.f32.vlgmr.msra.gmra.mxu0 %v2130_v0 }
 0x1b1   : > { %421 = vmatprep.mubr.f32.mxu0 %v2147_v6 }
 0x1b4   : > { %422 = vmatmul.mubr.f32.gmra.mxu0 %v2144_v5 }
 0x1b5   : > { %426 = vmatprep.mubr.f32.mxu0 %v2141_v4 }
 0x1b8   : > { %427 = vmatmul.mubr.f32.gmra.mxu0 %v2136_v2 }
 0x1b9   : > { %431 = vmatprep.mubr.f32.mxu0 %v2156_v9 }
 0x1bc   : > { %432 = vmatmul.mubr.f32.gmra.mxu0 %v2153_v8 }
 0x1bd   : > { %436 = vmatprep.mubr.f32.mxu0 %v2166_v13 }
 0x1c0   : > { %437 = vmatmul.mubr.f32.gmra.mxu0 %v2163_v12 }
 0x1f9   : > { %v1898_v55 = vpop.permute.xlu1 %1897 }
 0x1fa   : > { %v1900_v21 = vunpack.i.h.bf16 %v1898_v55  ;;  %v1899_v0 = vunpack.i.l.bf16 %v1898_v55 }
 0x1fc   : > { %v771_v6 = vsel %vm750_vm3, %v1900_v21, %v1899_v0  ;;  %v751_v5 = vsel %vm750_vm3, %v1899_v0, %v1900_v21 }
 0x1fd   : > { %v1903_v22 = vpop.permute.xlu0 %1902  ;;  %v1908_v4 = vpop.permute.xlu1 %1907  ;;  %v777_v2 = vmax.f32 %v2332_v35, %v771_v6  ;;  %v776_v9 = vmax.f32 %v2329_v34, %v751_v5 }
 0x1fe   : > { %v1905_v56 = vunpack.i.h.bf16 %v1903_v22  ;;  %v1904_v8 = vunpack.i.l.bf16 %v1903_v22  ;;  %v1910_v23 = vunpack.i.h.bf16 %v1908_v4  ;;  %v1909_v13 = vunpack.i.l.bf16 %v1908_v4 }
 0x1ff   : > { %882 = vmatprep.mubr.f32.mxu1 %v777_v2 }
 0x200   : > { %883 = vmatmul.mubr.f32.vlgmr.msra.gmra.mxu1 %v776_v9  ;;  %v772_v12 = vsel %vm750_vm3, %v1905_v56, %v1904_v8  ;;  %v752_v24 = vsel %vm750_vm3, %v1904_v8, %v1905_v56  ;;  %v773_v61 = vsel %vm750_vm3, %v1910_v23, %v1909_v13  ;;  %v753_v15 = vsel %vm750_vm3, %v1909_v13, %v1910_v23  ;;  %v960_v23 = vld [vmem:[%s2762_s4] sm:$0xff] }
 0x201   : > { %v779_v3 = vmax.f32 %v2344_v47, %v772_v12  ;;  %v778_v37 = vmax.f32 %v2341_v63, %v752_v24  ;;  %v781_v10 = vmax.f32 %v2350_v49, %v773_v61  ;;  %v780_v47 = vmax.f32 %v2347_v48, %v753_v15  ;;  %1741 = vmatprep.mubr.msk.f32.mxu0 %vm974_vm4, %v960_v23  ;;  %v963_v12 = vld [vmem:[%s2763_s5 + $0x8] sm:$0x3]  ;;  %v1065_v15 = vld [vmem:[%s2765_s7 + $0x10] sm:$0xff] }
 0x202   : > { %v1913_v38 = vpop.permute.xlu0 %1912  ;;  %v1918_v35 = vpop.permute.xlu1 %1917  ;;  %v2024_v61 = vmov 0  }
 0x203   : > { %v1915_v7 = vunpack.i.h.bf16 %v1913_v38  ;;  %v1914_v34 = vunpack.i.l.bf16 %v1913_v38  ;;  %887 = vmatprep.mubr.f32.mxu1 %v779_v3  ;;  %v1920_v16 = vunpack.i.h.bf16 %v1918_v35  ;;  %v1919_v17 = vunpack.i.l.bf16 %v1918_v35  ;;  %1921 = vset.pattern.permute.xlu1 %v2024_v61  ;;  %v1063_v3 = vld [vmem:[%s2765_s7] sm:$0xff]  ;;  %v1064_v35 = vld [vmem:[%s2765_s7 + $0x8] sm:$0xff] }
 0x204   : > { %888 = vmatmul.mubr.f32.gmra.mxu1 %v778_v37  ;;  %1922 = vset.pattern.permute.xlu0 %v2024_v61 }
 0x205   : > { %892 = vmatprep.mubr.f32.mxu1 %v781_v10  ;;  %v774_v19 = vsel %vm750_vm3, %v1915_v7, %v1914_v34  ;;  %v754_v26 = vsel %vm750_vm3, %v1914_v34, %v1915_v7  ;;  %v775_v27 = vsel %vm750_vm3, %v1920_v16, %v1919_v17  ;;  %v755_v30 = vsel %vm750_vm3, %v1919_v17, %v1920_v16  ;;  %v1066_v34 = vld [vmem:[%s2765_s7 + $0x18] sm:$0xff]  ;;  %v962_v10 = vld [vmem:[%s2763_s5] sm:$0xff] }
 0x206   : > { %v461_v20 = vpop.permute.xlu0 %460  ;;  %v459_v25 = vpop.permute.xlu1 %458  ;;  %v783_v49 = vmax.f32 %v2364_v58, %v774_v19  ;;  %v782_v48 = vmax.f32 %v2361_v57, %v754_v26  ;;  %v785_v58 = vmax.f32 %v2370_v60, %v775_v27  ;;  %v784_v31 = vmax.f32 %v2367_v59, %v755_v30  ;;  %v1067_v16 = vld [vmem:[%s2765_s7 + $0x20] sm:$0xff] }
 0x207   : > { %v471_v63 = vmax.f32 %v2378_v32, %v461_v20  ;;  %v470_v1 = vmax.f32 %v2382_v36, %v459_v25 }
 0x208   : > { %893 = vmatmul.mubr.f32.gmra.mxu1 %v780_v47 }
 0x209   : > { %485 = vrot.lane.b32.xlu1 %v471_v63, %s2020_s24  ;;  %483 = vrot.lane.b32.xlu0 %v470_v1, %s2020_s24 }
 0x20a   : > { %v457_v28 = vpop.permute.xlu0 %456  ;;  %v455_v29 = vpop.permute.xlu1 %454  ;;  %897 = vmatprep.mubr.f32.mxu1 %v783_v49 }
 0x20b   : > { %v469_v32 = vmax.f32 %v2400_v11, %v457_v28  ;;  %v468_v36 = vmax.f32 %v2404_v14, %v455_v29 }
 0x20c   : > { %898 = vmatmul.mubr.f32.gmra.mxu1 %v782_v48 }
 0x20d   : > { %481 = vrot.lane.b32.xlu1 %v469_v32, %s2020_s24  ;;  %479 = vrot.lane.b32.xlu0 %v468_v36, %s2020_s24 }
 0x20e   : > { %902 = vmatprep.mubr.f32.mxu1 %v785_v58  ;;  %v453_v33 = vpop.permute.xlu0 %452 }
 0x20f   : > { %v467_v39 = vmax.f32 %v2419_v18, %v453_v33 }
 0x210   : > { %903 = vmatmul.mubr.f32.gmra.mxu1 %v784_v31 }
 0x211   : > { %477 = vrot.lane.b32.xlu1 %v467_v39, %s2020_s24 }
 0x270   : > { %v1655_v17 = vpop.f32.mrf.mxu0 }
 0x272   : > { %v1656_v19 = vpop.f32.mrf.mxu0 }
 0x274   : > { %v1658_v20 = vpop.f32.mrf.mxu0 }
 0x276   : > { %v1659_v25 = vpop.f32.mrf.mxu0 }
 0x278   : > { %v1661_v47 = vpop.f32.mrf.mxu0 }
 0x27b   : > { %v486_v57 = vpop.permute.xlu1 %485  ;;  %v484_v11 = vpop.permute.xlu0 %483 }
 0x27c   : > { %v496_v14 = vmax.f32 %v471_v63, %v486_v57  ;;  %v495_v40 = vmax.f32 %v470_v1, %v484_v11  ;;  %v1662_v63 = vpop.f32.mrf.mxu0 }
 0x27d   : > { %v1663_v31 = vadd.f32 %v1662_v63, %v1661_v47 }
 0x27e   : > { %510 = vrot.lane.b32.xlu0 %v496_v14, %s2021_s25  ;;  %508 = vrot.lane.b32.xlu1 %v495_v40, %s2021_s25  ;;  %v1664_v1 = vpop.f32.mrf.mxu0 }
 0x27f   : > { %v482_v60 = vpop.permute.xlu1 %481  ;;  %v480_v41 = vpop.permute.xlu0 %479 }
 0x280   : > { %v494_v42 = vmax.f32 %v469_v32, %v482_v60  ;;  %v493_v43 = vmax.f32 %v468_v36, %v480_v41  ;;  %v1665_v49 = vpop.f32.mrf.mxu0 }
 0x281   : > { %v1666_v36 = vadd.f32 %v1665_v49, %v1664_v1  ;;  %v1271_v1 = vld [vmem:[%s2761_s3 + $0x68] sm:$0xff]  ;;  %v1270_v49 = vld [vmem:[%s2761_s3 + $0x60] sm:$0xff] }
 0x282   : > { %506 = vrot.lane.b32.xlu0 %v494_v42, %s2021_s25  ;;  %504 = vrot.lane.b32.xlu1 %v493_v43, %s2021_s25  ;;  %v1667_v27 = vpop.f32.mrf.mxu0 }
 0x283   : > { %v478_v44 = vpop.permute.xlu1 %477 }
 0x284   : > { %v492_v59 = vmax.f32 %v467_v39, %v478_v44  ;;  %v1668_v29 = vpop.f32.mrf.mxu0 }
 0x285   : > { %v1669_v48 = vadd.f32 %v1668_v29, %v1667_v27  ;;  %v1272_v27 = vld [vmem:[%s2761_s3 + $0x70] sm:$0xff]  ;;  %v1269_v29 = vld [vmem:[%s2761_s3 + $0x58] sm:$0xff] }
 0x286   : > { %502 = vrot.lane.b32.xlu0 %v492_v59, %s2021_s25 }
 0x2c0   : > { %v1702_v18 = vpop.f32.mrf.mxu1 }
 0x2c2   : > { %v1703_v45 = vpop.f32.mrf.mxu1 }
 0x2c3   : > { %v1704_v22 = vadd.f32 %v1703_v45, %v1702_v18 }
 0x2c4   : > { %v1705_v46 = vpop.f32.mrf.mxu1 }
 0x2c6   : > { %v1706_v62 = vpop.f32.mrf.mxu1 }
 0x2c7   : > { %v1707_v5 = vadd.f32 %v1706_v62, %v1705_v46 }
 0x2c8   : > { %v1708_v50 = vpop.f32.mrf.mxu1 }
 0x2ca   : > { %v1709_v51 = vpop.f32.mrf.mxu1 }
 0x2cb   : > { %v1710_v52 = vadd.f32 %v1709_v51, %v1708_v50  ;;  %v961_v51 = vld [vmem:[%s2762_s4 + $0x8] sm:$0x3] }
 0x2cc   : > { %v1711_v53 = vpop.f32.mrf.mxu1 }
 0x2cd   : > { %917 = vrot.lane.b32.xlu1 %v1710_v52, %s2022_s26  ;;  %v2025_v52 = vmov 0.0  }
 0x2ce   : > { %v1712_v54 = vpop.f32.mrf.mxu1  ;;  %1763 = vmatprep.subr.mxu1 %v2025_v52  ;;  %1754 = vmatprep.mubr.msk.f32.mxu1 %vm2026_vm7, %v2025_v52 }
 0x2cf   : > { %v1713_v55 = vadd.f32 %v1712_v54, %v1711_v53 }
 0x2d0   : > { %v1714_v21 = vpop.f32.mrf.mxu1 }
 0x2d1   : > { %919 = vrot.lane.b32.xlu1 %v1713_v55, %s2022_s26 }
 0x2d2   : > { %v1715_v0 = vpop.f32.mrf.mxu1 }
 0x2d3   : > { %v1716_v6 = vadd.f32 %v1715_v0, %v1714_v21 }
 0x2d5   : > { %921 = vrot.lane.b32.xlu1 %v1716_v6, %s2022_s26 }
 0x2d9   : > { %915 = vrot.lane.b32.xlu1 %v1707_v5, %s2022_s26 }
 0x2dd   : > { %913 = vrot.lane.b32.xlu1 %v1704_v22, %s2022_s26 }
 0x2e1   : > { %971 = vperm.xlu1 %1921, %v963_v12  }
 0x2e5   : > { %1070 = vperm.xlu1 %1921, %v1063_v3  }
 0x2e9   : > { %1075 = vperm.xlu1 %1921, %v1064_v35  }
 0x2ed   : > { %1085 = vperm.xlu1 %1921, %v1066_v34  }
 0x2f0   : > { %v511_v4 = vpop.permute.xlu0 %510  ;;  %v509_v9 = vpop.permute.xlu1 %508 }
 0x2f1   : > { %v521_v2 = vmax.f32 %v496_v14, %v511_v4  ;;  %v520_v56 = vmax.f32 %v495_v40, %v509_v9  ;;  %v1660_v40 = vadd.f32 %v1659_v25, %v1658_v20  ;;  %v1058_v4 = vld [vmem:[%s2764_s6] sm:$0xff]  ;;  %v1059_v9 = vld [vmem:[%s2764_s6 + $0x8] sm:$0xff] }
 0x2f3   : > { %941 = vrot.lane.b32.xlu0 %v521_v2, %s2023_s10  ;;  %v1060_v2 = vld [vmem:[%s2764_s6 + $0x10] sm:$0xff] }
 0x2f4   : > { %v507_v8 = vpop.permute.xlu0 %506  ;;  %v505_v24 = vpop.permute.xlu1 %504 }
 0x2f5   : > { %v519_v13 = vmax.f32 %v494_v42, %v507_v8  ;;  %v518_v37 = vmax.f32 %v493_v43, %v505_v24  ;;  %v1657_v43 = vadd.f32 %v1656_v19, %v1655_v17  ;;  %v1062_v8 = vld [vmem:[%s2764_s6 + $0x20] sm:$0xff] }
 0x2f7   : > { %939 = vrot.lane.b32.xlu0 %v520_v56, %s2023_s10  ;;  %v1061_v56 = vld [vmem:[%s2764_s6 + $0x18] sm:$0xff] }
 0x2f8   : > { %v503_v38 = vpop.permute.xlu0 %502 }
 0x2f9   : > { %v517_v7 = vmax.f32 %v492_v59, %v503_v38 }
 0x2fb   : > { %937 = vrot.lane.b32.xlu0 %v519_v13, %s2023_s10 }
 0x2ff   : > { %935 = vrot.lane.b32.xlu0 %v518_v37, %s2023_s10 }
 0x303   : > { %933 = vrot.lane.b32.xlu0 %v517_v7, %s2023_s10  ;;  %s1622_s10 = smul.u32 1280, %s2096_s9 }
 0x305   : > { %s2709_s26 = scalar_lea.hbm %s2766_s8, %s1622_s10 }
 0x307   : > { %966 = vperm.xlu0 %1922, %v962_v10  }
 0x30b   : > { %1080 = vperm.xlu0 %1922, %v1065_v15  }
 0x30f   : > { %1090 = vperm.xlu0 %1922, %v1067_v16  }
 0x33f   : > { %v918_v26 = vpop.permute.xlu1 %917 }
 0x340   : > { %v951_v60 = vsel %vm948_vm6, %v1663_v31, %v918_v26  ;;  %v1273_v26 = vld [vmem:[%s2761_s3 + $0x78] sm:$0xff]  ;;  %v1259_v31 = vld [vmem:[%s2761_s3 + $0x8] sm:$0xff] }
 0x343   : > { %v920_v28 = vpop.permute.xlu1 %919 }
 0x344   : > { %v952_v39 = vsel %vm948_vm6, %v1666_v36, %v920_v28  ;;  %v1267_v28 = vld [vmem:[%s2761_s3 + $0x48] sm:$0xff] }
 0x345   : > { %v1263_v36 = vld [vmem:[%s2761_s3 + $0x28] sm:$0xff] }
 0x347   : > { %v922_v32 = vpop.permute.xlu1 %921 }
 0x348   : > { %v953_v30 = vsel %vm948_vm6, %v1669_v48, %v922_v32  ;;  %v1266_v48 = vld [vmem:[%s2761_s3 + $0x40] sm:$0xff]  ;;  %v1268_v32 = vld [vmem:[%s2761_s3 + $0x50] sm:$0xff] }
 0x34b   : > { %v916_v14 = vpop.permute.xlu1 %915 }
 0x34c   : > { %v950_v44 = vsel %vm948_vm6, %v1660_v40, %v916_v14 }
 0x34f   : > { %v914_v18 = vpop.permute.xlu1 %913 }
 0x350   : > { %v949_v46 = vsel %vm948_vm6, %v1657_v43, %v914_v18 }
 0x35c   : > { %v972_v53 = vpop.permute.xlu1 %971 }
 0x360   : > { %v1071_v23 = vpop.permute.xlu1 %1070 }
 0x364   : > { %v1076_v24 = vpop.permute.xlu1 %1075 }
 0x365   : > { %v942_v58 = vpop.permute.xlu0 %941 }
 0x366   : > { %v959_v33 = vsel %vm954_vm5, %v953_v30, %v942_v58  ;;  %v1265_v30 = vld [vmem:[%s2761_s3 + $0x38] sm:$0xff]  ;;  %v1262_v58 = vld [vmem:[%s2761_s3 + $0x20] sm:$0xff] }
 0x367   : > { %1731 = vmatprep.subr.mxu0 %v959_v33 }
 0x368   : > { %1732 = vmatpush3.msra.mxu0 %v959_v33  ;;  %v1086_v17 = vpop.permute.xlu1 %1085  ;;  %v1264_v33 = vld [vmem:[%s2761_s3 + $0x30] sm:$0xff] }
 0x369   : > { %v940_v57 = vpop.permute.xlu0 %939 }
 0x36a   : > { %v958_v11 = vsel %vm954_vm5, %v952_v39, %v940_v57  ;;  %v1261_v39 = vld [vmem:[%s2761_s3 + $0x18] sm:$0xff]  ;;  %v1258_v57 = vld [vmem:[%s2761_s3] sm:$0xff] }
 0x36b   : > { %1733 = vmatprep.subr.mxu0 %v958_v11 }
 0x36c   : > { %1734 = vmatpush3.msra.mxu0 %v958_v11  ;;  %v1260_v11 = vld [vmem:[%s2761_s3 + $0x10] sm:$0xff] }
 0x36d   : > { %v938_v41 = vpop.permute.xlu0 %937 }
 0x36e   : > { %v957_v42 = vsel %vm954_vm5, %v951_v60, %v938_v41 }
 0x36f   : > { %1735 = vmatprep.subr.mxu0 %v957_v42 }
 0x370   : > { %1736 = vmatpush3.msra.mxu0 %v957_v42 }
 0x371   : > { %v936_v59 = vpop.permute.xlu0 %935 }
 0x372   : > { %v956_v45 = vsel %vm954_vm5, %v950_v44, %v936_v59 }
 0x373   : > { %1737 = vmatprep.subr.mxu0 %v956_v45 }
 0x374   : > { %1738 = vmatpush3.msra.mxu0 %v956_v45 }
 0x375   : > { %v934_v62 = vpop.permute.xlu0 %933 }
 0x376   : > { %v955_v50 = vsel %vm954_vm5, %v949_v46, %v934_v62 }
 0x377   : > { %1739 = vmatprep.subr.mxu0 %v955_v50 }
 0x378   : > { %1740 = vmatpush3.msra.mxu0 %v955_v50 }
 0x379   : > { %1742 = vmatmul.mubr.msk.f32.vlgmr.msra.gmra.mxu0 %vm974_vm4, %v961_v51  ;;  %1744 = vmatprep.subr.mxu0 %v2025_v52 }
 0x37a   : > { %1748 = vmatprep.mubr.msk.f32.mxu0 %vm2026_vm7, %v2025_v52 }
 0x382   : > { %v967_v21 = vpop.permute.xlu0 %966 }
 0x386   : > { %v1081_v61 = vpop.permute.xlu0 %1080 }
 0x38a   : > { %v1091_v19 = vpop.permute.xlu0 %1090 }
 0x439   : > { %v1743_v54 = vpop.f32.mrf.mxu0 }
 0x43a   : > { %v1053_v55 = vadd.f32 %v1743_v54, %v972_v53 }
 0x43b   : > { %v1047_v0 = vpop.f32.mrf.mxu0 }
 0x43c   : > { %v1057_v6 = vmax.f32 %v1053_v55, 0.0  ;;  %v1048_v5 = vadd.f32 %v1047_v0, %v967_v21 }
 0x43e   : > { %v1056_v22 = vmax.f32 %v1048_v5, 0.0  ;;  %1745 = vmatpush3.msk.msra.mxu0 %vm1109_vm8, %v1057_v6  ;;  %1765 = vmatpush3.msk.msra.mxu1 %vm1109_vm8, %v1057_v6 }
 0x43f   : > { %1746 = vmatprep.subr.mxu0 %v2025_v52  ;;  %1764 = vmatprep.subr.mxu1 %v2025_v52 }
 0x440   : > { %1747 = vmatpush3.msra.mxu0 %v1056_v22  ;;  %1766 = vmatpush3.msra.mxu1 %v1056_v22 }
 0x441   : > { %1749 = vmatmul.mubr.msk.f32.vlgmr.msra.gmra.mxu0 %vm1093_vm9, %v1058_v4  ;;  %1755 = vmatmul.mubr.msk.f32.vlgmr.msra.gmra.mxu1 %vm1093_vm9, %v1060_v2 }
 0x442   : > { %1751 = vmatprep.mubr.msk.f32.mxu0 %vm2026_vm7, %v2025_v52  ;;  %1757 = vmatprep.mubr.msk.f32.mxu1 %vm2026_vm7, %v2025_v52 }
 0x443   : > { %1313 = vmatprep.subr.mxu0 %v1271_v1  ;;  %1408 = vmatprep.subr.mxu1 %v1273_v26 }
 0x444   : > { %1314 = vmatpush1.msra.mxu0 %v1270_v49  ;;  %1409 = vmatpush1.msra.mxu1 %v1272_v27  ;;  %v1946_v49 = vld [vmem:[%s2127_s21 + $0x18] sm:$0xff] }
 0x445   : > { %1752 = vmatmul.mubr.msk.f32.gmra.mxu0 %vm1093_vm9, %v1059_v9  ;;  %1758 = vmatmul.mubr.msk.f32.gmra.mxu1 %vm1093_vm9, %v1061_v56 }
 0x446   : > { %1760 = vmatprep.mubr.msk.f32.mxu1 %vm2026_vm7, %v2025_v52  ;;  %1353 = vmatprep.mubr.f32.mxu0 %v2025_v52 }
 0x447   : > { %1315 = vmatprep.subr.mxu0 %v1267_v28  ;;  %1410 = vmatprep.subr.mxu1 %v1269_v29 }
 0x448   : > { %1316 = vmatpush1.msra.mxu0 %v1266_v48  ;;  %1411 = vmatpush1.msra.mxu1 %v1268_v32  ;;  %v1947_v32 = vld [vmem:[%s2127_s21 + $0x20] sm:$0xff] }
 0x449   : > { %1761 = vmatmul.mubr.msk.f32.gmra.mxu1 %vm1093_vm9, %v1062_v8  ;;  %1317 = vmatprep.subr.mxu0 %v1263_v36 }
 0x44a   : > { %1448 = vmatprep.mubr.f32.mxu1 %v2025_v52  ;;  %1412 = vmatprep.subr.mxu1 %v1265_v30 }
 0x44b   : > { %1318 = vmatpush1.msra.mxu0 %v1262_v58  ;;  %1413 = vmatpush1.msra.mxu1 %v1264_v33 }
 0x44c   : > { %1319 = vmatprep.subr.mxu0 %v1259_v31  ;;  %1414 = vmatprep.subr.mxu1 %v1261_v39  ;;  %v1948_v31 = vld [vmem:[%s2127_s21 + $0x28] sm:$0xff] }
 0x44d   : > { %1320 = vmatpush1.msra.mxu0 %v1258_v57  ;;  %1415 = vmatpush1.msra.mxu1 %v1260_v11 }
 0x501   : > { %v1179_v13 = vpop.f32.mrf.mxu0  ;;  %v1189_v12 = vpop.f32.mrf.mxu1 }
 0x502   : > { %v1180_v3 = vadd.f32 %v1179_v13, %v1071_v23  ;;  %v1190_v34 = vadd.f32 %v1189_v12, %v1081_v61 }
 0x503   : > { %v1750_v37 = vpop.f32.mrf.mxu0  ;;  %v1756_v38 = vpop.f32.mrf.mxu1 }
 0x504   : > { %1208 = vrot.lane.b32.xlu1 %v1180_v3, %s2020_s24 }
 0x505   : > { %v1184_v35 = vpop.f32.mrf.mxu0  ;;  %v1194_v7 = vpop.f32.mrf.mxu1 }
 0x506   : > { %v1185_v10 = vadd.f32 %v1184_v35, %v1076_v24  ;;  %v1195_v25 = vadd.f32 %v1194_v7, %v1086_v17  ;;  %v1943_v35 = vld [vmem:[%s2127_s21] sm:$0xff] }
 0x507   : > { %v1759_v15 = vpop.f32.mrf.mxu1  ;;  %v1753_v16 = vpop.f32.mrf.mxu0 }
 0x508   : > { %1212 = vrot.lane.b32.xlu1 %v1190_v34, %s2020_s24  ;;  %1210 = vrot.lane.b32.xlu0 %v1185_v10, %s2020_s24 }
 0x509   : > { %v1199_v20 = vpop.f32.mrf.mxu1 }
 0x50a   : > { %v1200_v47 = vadd.f32 %v1199_v20, %v1091_v19 }
 0x50b   : > { %v1762_v63 = vpop.f32.mrf.mxu1 }
 0x50c   : > { %1216 = vrot.lane.b32.xlu1 %v1200_v47, %s2020_s24  ;;  %1214 = vrot.lane.b32.xlu0 %v1195_v25, %s2020_s24  ;;  %s299_s24 = sand.u32 1, %s2005_s28  }
 0x50d   : > { %s1767_s19 = smul.u32 80, %s299_s24  ;;  %s2718_s9 = scalar_lea.sflag [#allocation3], %s299_s24 }
 0x50f   : > { %s2686_s20 = scalar_lea.vmem [#allocation2], %s1767_s19 }
 0x510   : > { %s1524_s22 = sshll.u32 %s2686_s20, 4  ;;  %s2711_s22 = int_to_ptr.vmem [resolvable:$true] %s1524_s22 }
 0x511   : > { %s1953_s12 = scalar_lea.vmem %s2711_s22, 1280  ;;  %p1960_p0 = scmp.lt.s32.totalorder %s2711_s22, %s1958_s17 }
 0x512   : > { %p1954_p11 = scmp.ne.s32.totalorder %s2711_s22, %s1953_s12  ;;  %p1961_p1 = scmp.lt.s32.totalorder %s1959_s18, %s1953_s12 }
 0x514   : > { %p1955_p12 = pnand %p1954_p11, %p2113_p5  ;;  %p1962_p2 = por %p1961_p1, %p1960_p0 }
 0x516   : > { %p1956_p13 = pneg %p1955_p12 }
 0x518   : > { %p1963_p3 = pnand %p1962_p2, %p1956_p13 }
 0x576   : > { %v1209_v14 = vpop.permute.xlu1 %1208 }
 0x577   : > { %v1223_v40 = vadd.f32 %v1209_v14, %v1180_v3 }
 0x579   : > { %v1600_v60 = vmul.f32 -1.442695, %v1223_v40  ;;  %v1949_v40 = vld [vmem:[%s2127_s21 + $0x30] sm:$0xff] }
 0x57a   : > { %v1213_v41 = vpop.permute.xlu1 %1212  ;;  %v1211_v42 = vpop.permute.xlu0 %1210 }
 0x57b   : > { %1923 = vpow2.f32 %v1600_v60  ;;  %v1225_v43 = vadd.f32 %v1213_v41, %v1190_v34  ;;  %v1224_v44 = vadd.f32 %v1211_v42, %v1185_v10 }
 0x57d   : > { %v1602_v59 = vmul.f32 -1.442695, %v1225_v43  ;;  %v1601_v18 = vmul.f32 -1.442695, %v1224_v44  ;;  %v1950_v44 = vld [vmem:[%s2127_s21 + $0x38] sm:$0xff] }
 0x57e   : > { %v1217_v45 = vpop.permute.xlu1 %1216  ;;  %v1215_v46 = vpop.permute.xlu0 %1214 }
 0x57f   : > { %1925 = vpow2.f32 %v1602_v59  ;;  %v1226_v62 = vadd.f32 %v1215_v46, %v1195_v25  ;;  %v1227_v50 = vadd.f32 %v1217_v45, %v1200_v47  ;;  %v1945_v25 = vld [vmem:[%s2127_s21 + $0x10] sm:$0xff] }
 0x580   : > { %1927 = vpow2.f32 %v1601_v18 }
 0x581   : > { %v1603_v51 = vmul.f32 -1.442695, %v1226_v62  ;;  %v1604_v53 = vmul.f32 -1.442695, %v1227_v50  ;;  %v1951_v62 = vld [vmem:[%s2127_s21 + $0x40] sm:$0xff] }
 0x583   : > { %1929 = vpow2.f32 %v1603_v51 }
 0x584   : > { %1931 = vpow2.f32 %v1604_v53  ;;  %v1952_v53 = vld [vmem:[%s2127_s21 + $0x48] sm:$0xff] }
 0x588   : > { %v1924_v54 = vpop.eup %1923 }
 0x589   : > { %v1243_v55 = vadd.f32 1.0, %v1924_v54 }
 0x58b   : > { %1933 = vrcp.f32 %v1243_v55 }
 0x58c   : > { %v1926_v21 = vpop.eup %1925 }
 0x58d   : > { %v1928_v0 = vpop.eup %1927  ;;  %v1245_v5 = vadd.f32 1.0, %v1926_v21 }
 0x58e   : > { %v1244_v6 = vadd.f32 1.0, %v1928_v0 }
 0x590   : > { %1935 = vrcp.f32 %v1244_v6  ;;  %v1930_v22 = vpop.eup %1929 }
 0x591   : > { %1937 = vrcp.f32 %v1245_v5  ;;  %v1246_v4 = vadd.f32 1.0, %v1930_v22  ;;  %v1932_v2 = vpop.eup %1931 }
 0x592   : > { %v1247_v56 = vadd.f32 1.0, %v1932_v2 }
 0x593   : > { %1939 = vrcp.f32 %v1246_v4 }
 0x594   : > { %1941 = vrcp.f32 %v1247_v56 }
 0x598   : > { %v1934_v9 = vpop.eup %1933 }
 0x599   : > { %1605 = vmatmul.mubr.msk.f32.vlgmr.msra.gmra.mxu0 %vm948_vm6, %v1934_v9  ;;  %1610 = vmatmul.mubr.msk.f32.vlgmr.msra.gmra.mxu1 %vm948_vm6, %v1934_v9 }
 0x59a   : > { %1359 = vmatprep.mubr.f32.mxu0 %v2025_v52  ;;  %1454 = vmatprep.mubr.f32.mxu1 %v2025_v52 }
 0x59d   : > { %v1936_v8 = vpop.eup %1935 }
 0x59e   : > { %1606 = vmatmul.mubr.msk.f32.gmra.mxu0 %vm948_vm6, %v1936_v8  ;;  %1611 = vmatmul.mubr.msk.f32.gmra.mxu1 %vm948_vm6, %v1936_v8  ;;  %v1938_v23 = vpop.eup %1937 }
 0x59f   : > { %1365 = vmatprep.mubr.f32.mxu0 %v2025_v52  ;;  %1460 = vmatprep.mubr.f32.mxu1 %v2025_v52 }
 0x5a0   : > { %v1940_v13 = vpop.eup %1939 }
 0x5a1   : > { %v1942_v12 = vpop.eup %1941 }
 0x5a2   : > { %1607 = vmatmul.mubr.msk.f32.gmra.mxu0 %vm948_vm6, %v1938_v23  ;;  %1612 = vmatmul.mubr.msk.f32.gmra.mxu1 %vm948_vm6, %v1938_v23 }
 0x5a3   : > { %1371 = vmatprep.mubr.f32.mxu0 %v2025_v52  ;;  %1466 = vmatprep.mubr.f32.mxu1 %v2025_v52 }
 0x5a6   : > { %1608 = vmatmul.mubr.msk.f32.gmra.mxu0 %vm948_vm6, %v1940_v13  ;;  %1613 = vmatmul.mubr.msk.f32.gmra.mxu1 %vm948_vm6, %v1940_v13 }
 0x5a7   : > { %1377 = vmatprep.mubr.f32.mxu0 %v2025_v52  ;;  %1472 = vmatprep.mubr.f32.mxu1 %v2025_v52  ;;  %v1944_v52 = vld [vmem:[%s2127_s21 + $0x8] sm:$0xff] }
 0x5aa   : > { %1609 = vmatmul.mubr.msk.f32.gmra.mxu0 %vm948_vm6, %v1942_v12  ;;  %1614 = vmatmul.mubr.msk.f32.gmra.mxu1 %vm948_vm6, %v1942_v12 }
 0x659   : > { %v1355_v24 = vpop.f32.mrf.mxu0  ;;  %v1450_v61 = vpop.f32.mrf.mxu1 }
 0x65a   : > { %v1479_v3 = vmul.f32 %v1450_v61, %v1355_v24 }
 0x65b   : > { %v1357_v37 = vpop.f32.mrf.mxu0  ;;  %v1452_v38 = vpop.f32.mrf.mxu1 }
 0x65c   : > { %v1489_v7 = vmul.f32 %v1943_v35, %v1479_v3  ;;  %v1480_v34 = vmul.f32 %v1452_v38, %v1357_v37 }
 0x65e   : > { %1499 = vst [vmem:[%s2686_s20] sm:$0xff] %v1489_v7  ;;  %v1490_v10 = vmul.f32 %v1944_v52, %v1480_v34  ;;  %v1361_v15 = vpop.f32.mrf.mxu0  ;;  %v1456_v16 = vpop.f32.mrf.mxu1 }
 0x65f   : > { %v1481_v17 = vmul.f32 %v1456_v16, %v1361_v15 }
 0x660   : > { %1500 = vst [vmem:[%s2686_s20 + $0x8] sm:$0xff] %v1490_v10  ;;  %v1363_v19 = vpop.f32.mrf.mxu0  ;;  %v1458_v20 = vpop.f32.mrf.mxu1 }
 0x661   : > { %v1491_v47 = vmul.f32 %v1945_v25, %v1481_v17  ;;  %v1482_v63 = vmul.f32 %v1458_v20, %v1363_v19 }
 0x662   : > { %v1367_v1 = vpop.f32.mrf.mxu0  ;;  %v1462_v26 = vpop.f32.mrf.mxu1 }
 0x663   : > { %1501 = vst [vmem:[%s2686_s20 + $0x10] sm:$0xff] %v1491_v47  ;;  %v1492_v27 = vmul.f32 %v1946_v49, %v1482_v63  ;;  %v1483_v28 = vmul.f32 %v1462_v26, %v1367_v1 }
 0x664   : > { %v1369_v29 = vpop.f32.mrf.mxu0  ;;  %v1464_v48 = vpop.f32.mrf.mxu1 }
 0x665   : > { %1502 = vst [vmem:[%s2686_s20 + $0x18] sm:$0xff] %v1492_v27  ;;  %v1493_v36 = vmul.f32 %v1947_v32, %v1483_v28  ;;  %v1484_v30 = vmul.f32 %v1464_v48, %v1369_v29 }
 0x666   : > { %v1373_v58 = vpop.f32.mrf.mxu0  ;;  %v1468_v33 = vpop.f32.mrf.mxu1 }
 0x667   : > { %1503 = vst [vmem:[%s2686_s20 + $0x20] sm:$0xff] %v1493_v36  ;;  %v1494_v39 = vmul.f32 %v1948_v31, %v1484_v30  ;;  %v1485_v57 = vmul.f32 %v1468_v33, %v1373_v58 }
 0x668   : > { %v1375_v11 = vpop.f32.mrf.mxu0  ;;  %v1470_v14 = vpop.f32.mrf.mxu1 }
 0x669   : > { %1504 = vst [vmem:[%s2686_s20 + $0x28] sm:$0xff] %v1494_v39  ;;  %v1495_v60 = vmul.f32 %v1949_v40, %v1485_v57  ;;  %v1486_v41 = vmul.f32 %v1470_v14, %v1375_v11 }
 0x66a   : > { %v1379_v42 = vpop.f32.mrf.mxu0  ;;  %v1474_v43 = vpop.f32.mrf.mxu1 }
 0x66b   : > { %1505 = vst [vmem:[%s2686_s20 + $0x30] sm:$0xff] %v1495_v60  ;;  %v1496_v59 = vmul.f32 %v1950_v44, %v1486_v41  ;;  %v1487_v18 = vmul.f32 %v1474_v43, %v1379_v42 }
 0x66c   : > { %v1381_v45 = vpop.f32.mrf.mxu0  ;;  %v1476_v46 = vpop.f32.mrf.mxu1 }
 0x66d   : > { %1506 = vst [vmem:[%s2686_s20 + $0x38] sm:$0xff] %v1496_v59  ;;  %v1497_v50 = vmul.f32 %v1951_v62, %v1487_v18  ;;  %v1488_v51 = vmul.f32 %v1476_v46, %v1381_v45 }
 0x66f   : > { %1507 = vst [vmem:[%s2686_s20 + $0x40] sm:$0xff] %v1497_v50  ;;  %v1498_v54 = vmul.f32 %v1952_v53, %v1488_v51 }
 0x671   : > { %1508 = vst [vmem:[%s2686_s20 + $0x48] sm:$0xff] %v1498_v54 }
 0x672   : > { %1966 = shalt.err (!%p1963_p3)
}
 0x673   : > { %s1967_s21 = scalar_lea.hbm %s2709_s26, 1280  ;;  %s1971_s20 = scalar_lea.hbm %s2766_s8, 2560 }
 0x674   : > { %p1968_p4 = scmp.ne.s32.totalorder %s2709_s26, %s1967_s21  ;;  %p1972_p9 = scmp.lt.s32.totalorder %s2709_s26, %s2766_s8 }
 0x675   : > { %p1973_p10 = scmp.lt.s32.totalorder %s1971_s20, %s1967_s21 }
 0x676   : > { %p1969_p7 = pnand %p1968_p4, %p2113_p5 }
 0x677   : > { %p1974_p11 = por %p1973_p10, %p1972_p9 }
 0x678   : > { %p1970_p8 = pneg %p1969_p7 }
 0x67a   : > { %p1975_p12 = pnand %p1974_p11, %p1970_p8 }
 0x67c   : > { %1978 = shalt.err (!%p1975_p12)
}
 0x67d   : > { %s2028_s25 = smov 256   ;;  %s2029_s12 = smov 16  }
 0x67e   : > { %1768 = dma.vmem_to_hbm [thread:$0]  (%p2113_p5), %s2711_s22, 1280, %s2709_s26, %s2718_s9, %s2028_s25, %s2028_s25, %s2029_s12  }
 0x67f PF: > { %p1774_p13 = scmp.ge.s32.totalorder %s2013_s30, 2  ;;  %s1539_s13 = sand.u32 1, %s2001_s27  }
 0x680   : > { %s1540_s17 = scalar_lea.sflag [#allocation3], %s1539_s13 }
 0x681   : > { %p1771_p0 = pnand %p1774_p13, %p2117_p6 }
 0x683   : > { %p1772_p1 = pneg %p1771_p0 }
 0x685   : > { %1996 = dma.done.wait (%p1772_p1), %s1540_s17, 1280  }
 0x686   : > { %1998 = vsyncadd (%p1772_p1), %s1540_s17, 4294966016  ;;  %p18_p2 = scmp.ge.s32.totalorder %s2100_s11, 4   ;;  %s2769_s27 = smov %s2005_s28 }
 0x687   : > { %s2770_s28 = smov %s2009_s29  ;;  %s2771_s29 = smov %s2111_s14 }
 0x688   : > { %s2772_s30 = smov %s2100_s11  ;;  %20 = sbr.rel (!%p18_p2) target bundleno = 3 (0x3), region = 87 }
 0x68d   :  { %1545 = vsyncpa [#allocation3], 1 }
 0x68e   :  { %1547 = vsyncpa [#allocation3 + $0x1], 1 }

</bundles_post_ra>
